<compile_context>
chip_gen: v7x
topology: tpu7x:2x2x1
jax: 0.10.0
libtpu: 0.0.40
codegen_flags: <defaults>
</compile_context>

<pallas_src>
import jax
import jax.numpy as jnp
from jax.experimental import pallas as pl
from jax.experimental.pallas import tpu as pltpu


def attention_kernel(x_ref, w_ref, b_ref, out_ref):
    # x_ref:   (tb, S, D) VMEM block  — tb batch rows, full sequence
    # w_ref:   (1, D)     VMEM        — Linear(D, 1).weight, resident across steps
    # b_ref:   (1, 1)     SMEM        — Linear(D, 1).bias on the scalar path
    # out_ref: (tb, D) or (tb*D//128, 128) VMEM block — pooled context vectors
    x = x_ref[...].astype(jnp.float32)                       # (tb, S, D)
    w = w_ref[...].astype(jnp.float32)                       # (1, D)
    bias = b_ref[0, 0]                                       # scalar from SMEM
    tb, seq, d = x.shape

    # scores[t, s] = <x[t, s, :], w> + bias  ->  (tb, S)
    if d % 128 == 0:
        # Production-size D (multiple of 128): thin MXU matmul keeps the two
        # XLUs on v6e/v7x free for the HBM stream. (Not exercised at D = 32.)
        scores = jnp.dot(x.reshape(tb * seq, d), jnp.transpose(w),
                         preferred_element_type=jnp.float32).reshape(tb, seq) + bias
    else:
        # Small D: VPU multiply + lane reduce is the right choice.
        scores = jnp.sum(x * w, axis=-1) + bias              # (tb, S)

    # Numerically stable softmax over the sequence axis; normalization is
    # deferred to a single exact (tb, D) divide after pooling.
    m = jnp.max(scores, axis=1, keepdims=True)               # (tb, 1)
    e = jnp.exp(scores - m)                                   # (tb, S)
    denom = jnp.sum(e, axis=1, keepdims=True)                 # (tb, 1)

    # Pooling as a batched MXU contraction (q = 1): ctx[b, :] = e[b, :] @ x[b].
    # Avoids materializing a (tb, S, D) temporary and the lane->sublane
    # relayout of e that the broadcast-multiply form needs; the MXU is idle
    # in this memory-bound kernel, so the contraction is free filler.
    ctx = jnp.einsum("bqs,bsd->bqd", e[:, None, :], x,
                     preferred_element_type=jnp.float32)[:, 0, :]   # (tb, D)

    out = (ctx / denom).astype(out_ref.dtype)                 # exact normalization

    if out_ref.shape[-1] == d:
        out_ref[...] = out                                    # block already lane-dense / tiny case
    else:
        # Lane-dense store for D < 128: pack r = 128//D contiguous row-groups
        # of g = tb//r rows side by side along the lane axis (static,
        # sublane-aligned slices + lane concatenation only).  The wrapper
        # undoes this packing with a cheap reshape/transpose.
        r = out_ref.shape[-1] // d
        g = tb // r
        out_ref[...] = jnp.concatenate(
            [out[k * g:(k + 1) * g, :] for k in range(r)], axis=-1)


def _vmem_knobs():
    """Generation-aware (x double-buffer budget, scoped vmem_limit_bytes)."""
    vmem_cap = 64 * 1024 * 1024                 # conservative default (v7x per-TC)
    try:
        info = pltpu.get_tpu_info()
        vmem_cap = int(getattr(info, "vmem_capacity_bytes", vmem_cap))
    except Exception:
        pass                                    # best-effort query; fall back safely
    if vmem_cap > 96 * 1024 * 1024:             # v5e / v6e: 128 MiB physical
        return 40 * 1024 * 1024, 64 * 1024 * 1024
    return 24 * 1024 * 1024, 48 * 1024 * 1024   # v7x: 64 MiB per TensorCore


def _pick_batch_tile(B, S, D, itemsize, vmem_budget_bytes, sub, prefer_multi_step):
    """Returns (padded_B, tb).  tb is either the whole (padded) batch or a
    multiple of `sub` (sublane alignment), so every output block satisfies the
    (8,128) tiling rule."""
    per_row = 2 * S * D * itemsize              # double-buffered x bytes / batch row
    max_tb = max(1, vmem_budget_bytes // per_row)

    # Prefer >= 2 grid steps (v7x: shards the 'parallel' batch axis over both
    # TensorCores; elsewhere the ~0.35us/step cost is negligible).
    if prefer_multi_step and B >= 2 * sub:
        tb = min(max_tb, B // 2)
        tb -= tb % sub
        while tb >= sub:
            if B % tb == 0:
                return B, tb
            tb -= sub

    if B <= max_tb:
        return B, B                             # one step: block == full array dims

    tb = min(max_tb, B)
    tb -= tb % sub
    while tb >= sub:
        if B % tb == 0:
            return B, tb
        tb -= sub

    # Last resort: pad the batch so a sub-aligned tile divides it exactly
    # (padded zero rows are sliced off in the wrapper; exact).
    tb = max(sub, min(max_tb, B) - (min(max_tb, B) % sub))
    Bp = ((B + tb - 1) // tb) * tb
    return Bp, tb


def attention_forward(x, w, b, *, vmem_budget_bytes=None, vmem_limit_bytes=None,
                      prefer_multi_step=True, x_buffer_count=None):
    """x: (B, S, D) f32/bf16, w: (1, D), b: (1, 1).  Returns context (B, D)."""
    # TODO(synk): add a sequence-chunked (online-softmax) path — grid over S
    # marked 'arbitrary' with running max/denominator/accumulator scratch —
    # for sequences whose 2*S*D*itemsize per-row cost exceeds the VMEM budget.
    B, S, D = x.shape
    budget_d, limit_d = _vmem_knobs()
    budget = budget_d if vmem_budget_bytes is None else vmem_budget_bytes
    limit = limit_d if vmem_limit_bytes is None else vmem_limit_bytes

    itemsize = x.dtype.itemsize
    sub = 8 * max(1, 4 // itemsize)             # sublane alignment: 8 f32, 16 bf16
    Bp, tb = _pick_batch_tile(B, S, D, itemsize, budget, sub, prefer_multi_step)
    if Bp != B:
        x = jnp.pad(x, ((0, Bp - B), (0, 0), (0, 0)))
    grid = (Bp // tb,)

    # Lane-dense output when D < 128: r = 128//D row-groups packed per 128-lane
    # row (only when the packing keeps every output block sublane-aligned).
    lane_dense = (D < 128) and (128 % D == 0) and (tb % ((128 // D) * sub) == 0)
    if lane_dense:
        r = 128 // D
        g = tb // r
        out_shape = jax.ShapeDtypeStruct((Bp // r, 128), x.dtype)
        out_spec = pl.BlockSpec((g, 128), lambda i: (i, 0))
    else:
        out_shape = jax.ShapeDtypeStruct((Bp, D), x.dtype)
        out_spec = pl.BlockSpec((tb, D), lambda i: (i, 0))

    x_spec_kwargs = {}
    if x_buffer_count is not None:              # e.g. 3 on v7x if DMA is exposed
        x_spec_kwargs["pipeline_mode"] = pl.Buffered(x_buffer_count)

    out = pl.pallas_call(
        attention_kernel,
        out_shape=out_shape,
        grid_spec=pltpu.PrefetchScalarGridSpec(
            num_scalar_prefetch=0,
            grid=grid,
            in_specs=[
                pl.BlockSpec((tb, S, D), lambda i: (i, 0, 0), **x_spec_kwargs),
                pl.BlockSpec((1, D), lambda i: (0, 0)),             # resident weight
                pl.BlockSpec(memory_space=pltpu.MemorySpace.SMEM),  # bias scalar
            ],
            out_specs=out_spec,
        ),
        compiler_params=pltpu.CompilerParams(
            dimension_semantics=("parallel",),  # batch axis shards over TCs on v7x
            vmem_limit_bytes=limit,
        ),
    )(x, w, b)

    if lane_dense:
        # Undo in-kernel packing: A[i*g + j, k*D:(k+1)*D] == ctx[i*tb + k*g + j].
        out = (out.reshape(grid[0], g, r, D)
                  .transpose(0, 2, 1, 3)
                  .reshape(Bp, D))
    return out[:B] if Bp != B else out


def attention_reference(x, w, b):
    # Exact f32 reference (elementwise ops only — no TPU matmul precision games).
    scores = jnp.sum(x * w, axis=-1, keepdims=True) + b[0, 0]   # (B, S, 1)
    weights = jax.nn.softmax(scores, axis=1)
    return jnp.sum(weights * x, axis=1)                          # (B, D)


if __name__ == "__main__":
    key = jax.random.PRNGKey(0)
    kx1, kx2, kw, kb = jax.random.split(key, 4)

    hidden_dim = 16
    D = 2 * hidden_dim          # module operates on hidden_dim * 2 features
    S = 8

    # Deterministic init mimicking nn.Linear(D, 1): U(-1/sqrt(D), 1/sqrt(D))
    bound = 1.0 / jnp.sqrt(jnp.float32(D))
    w = jax.random.uniform(kw, (1, D), minval=-bound, maxval=bound, dtype=jnp.float32)
    b = jax.random.uniform(kb, (1, 1), minval=-bound, maxval=bound, dtype=jnp.float32)

    # Tolerance covers MXU f32 multi-pass rounding / reduction-order differences
    # in the pooling contraction; the softmax normalization itself is exact.
    tol = dict(atol=5e-3, rtol=5e-3)

    # Case 1: tiny shape straight from the module (B = 2) — single grid step,
    # full-array blocks.
    x1 = jax.random.normal(kx1, (2, S, D), dtype=jnp.float32)
    out1 = jax.block_until_ready(attention_forward(x1, w, b))
    ref1 = attention_reference(x1, w, b)
    assert out1.shape == (2, D)
    assert jnp.allclose(out1, ref1, **tol), (
        f"case1 max abs err {jnp.max(jnp.abs(out1 - ref1))}")

    # Case 2: larger batch — exercises the multi-step 'parallel' grid (two
    # TensorCores on v7x) and the lane-dense packed-output path.
    x2 = jax.random.normal(kx2, (64, S, D), dtype=jnp.float32)
    out2 = jax.block_until_ready(attention_forward(x2, w, b))
    ref2 = attention_reference(x2, w, b)
    assert out2.shape == (64, D)
    assert jnp.allclose(out2, ref2, **tol), (
        f"case2 max abs err {jnp.max(jnp.abs(out2 - ref2))}")

    print("KERNEL_OK")
</pallas_src>

<mosaic_0001>
module attributes {stable_mosaic.version = 11 : i64} {
  func.func @attention_kernel(%arg0: i32, %arg1: memref<2x8x32xf32, #tpu.memory_space<vmem>>, %arg2: memref<1x32xf32, #tpu.memory_space<vmem>>, %arg3: memref<1x1xf32, #tpu.memory_space<smem>>, %arg4: memref<2x32xf32, #tpu.memory_space<vmem>>) attributes {dimension_semantics = [#tpu.dimension_semantics<parallel>], iteration_bounds = array<i64: 1>, scalar_prefetch = 0 : i64, scratch_operands = 0 : i64, tpu.core_type = #tpu.core_type<tc>, window_params = [{transform_indices = @transform_0, window_bounds = array<i64: 2, 8, 32>}, {pipeline_mode = #tpu.pipeline_mode<synchronous>, transform_indices = @transform_1, window_bounds = array<i64: 1, 32>}, {transform_indices = @transform_2, window_bounds = array<i64: 1, 1>}, {transform_indices = @transform_3, window_bounds = array<i64: 2, 32>}]} {
    %c0 = arith.constant 0 : index
    %c0_0 = arith.constant 0 : index
    %c0_1 = arith.constant 0 : index
    %0 = vector.load %arg1[%c0, %c0_0, %c0_1] : memref<2x8x32xf32, #tpu.memory_space<vmem>>, vector<2x8x32xf32>
    %c0_2 = arith.constant 0 : index
    %c0_3 = arith.constant 0 : index
    %1 = vector.load %arg2[%c0_2, %c0_3] : memref<1x32xf32, #tpu.memory_space<vmem>>, vector<1x32xf32>
    %c0_4 = arith.constant 0 : index
    %c0_5 = arith.constant 0 : index
    %2 = memref.load %arg3[%c0_4, %c0_5] : memref<1x1xf32, #tpu.memory_space<smem>>
    %3 = vector.shape_cast %1 : vector<1x32xf32> to vector<1x1x32xf32>
    %4 = vector.broadcast %3 : vector<1x1x32xf32> to vector<2x8x32xf32>
    %5 = arith.mulf %0, %4 : vector<2x8x32xf32>
    %cst = arith.constant dense<0.000000e+00> : vector<2x8xf32>
    %6 = vector.multi_reduction <add>, %5, %cst [2] : vector<2x8x32xf32> to vector<2x8xf32>
    %7 = vector.broadcast %2 : f32 to vector<2x8xf32>
    %8 = arith.addf %6, %7 : vector<2x8xf32>
    %cst_6 = arith.constant dense<0xFF800000> : vector<2xf32>
    %9 = vector.multi_reduction <maximumf>, %8, %cst_6 [1] : vector<2x8xf32> to vector<2xf32>
    %10 = vector.shape_cast %9 : vector<2xf32> to vector<2x1xf32>
    %11 = vector.broadcast %10 : vector<2x1xf32> to vector<2x8xf32>
    %12 = arith.subf %8, %11 : vector<2x8xf32>
    %13 = math.exp %12 : vector<2x8xf32>
    %cst_7 = arith.constant dense<0.000000e+00> : vector<2xf32>
    %14 = vector.multi_reduction <add>, %13, %cst_7 [1] : vector<2x8xf32> to vector<2xf32>
    %15 = vector.shape_cast %14 : vector<2xf32> to vector<2x1xf32>
    %16 = vector.shape_cast %13 : vector<2x8xf32> to vector<2x1x8xf32>
    "tpu.trace_start"() <{level = 10 : i32, message = "bqs,bsd->bqd"}> : () -> ()
    %cst_8 = arith.constant dense<0.000000e+00> : vector<2x1x32xf32>
    %17 = tpu.matmul %16, %0, %cst_8 {dimension_numbers = #tpu.dot_dimension_numbers<[2], [1], [1], [2], [0, 0, 0, 1, 1, 2], [0], [0]>} : vector<2x1x8xf32>, vector<2x8x32xf32>, vector<2x1x32xf32> -> vector<2x1x32xf32>
    "tpu.trace_stop"() : () -> ()
    %18 = vector.shape_cast %17 : vector<2x1x32xf32> to vector<2x32xf32>
    %19 = vector.broadcast %15 : vector<2x1xf32> to vector<2x32xf32>
    %20 = arith.divf %18, %19 : vector<2x32xf32>
    %c0_9 = arith.constant 0 : index
    %c0_10 = arith.constant 0 : index
    %21 = vector.load %arg4[%c0_9, %c0_10] : memref<2x32xf32, #tpu.memory_space<vmem>>, vector<2x32xf32>
    tpu.vector_store %arg4[%c0_9, %c0_10], %20 {strides = array<i32>} : memref<2x32xf32, #tpu.memory_space<vmem>>, vector<2x32xf32>,
    return
  }
  func.func @transform_0(%arg0: i32) -> (i32, i32, i32) {
    %c0_i32 = arith.constant 0 : i32
    %c0_i32_0 = arith.constant 0 : i32
    %c0_i32_1 = arith.constant 0 : i32
    return %arg0, %c0_i32, %c0_i32_0 : i32, i32, i32
  }
  func.func @transform_1(%arg0: i32) -> (i32, i32) {
    %c0_i32 = arith.constant 0 : i32
    %c0_i32_0 = arith.constant 0 : i32
    %c0_i32_1 = arith.constant 0 : i32
    return %c0_i32, %c0_i32_0 : i32, i32
  }
  func.func @transform_2(%arg0: i32) -> (i32, i32) {
    %c0_i32 = arith.constant 0 : i32
    %c0_i32_0 = arith.constant 0 : i32
    %c0_i32_1 = arith.constant 0 : i32
    return %c0_i32, %c0_i32_0 : i32, i32
  }
  func.func @transform_3(%arg0: i32) -> (i32, i32) {
    %c0_i32 = arith.constant 0 : i32
    %c0_i32_0 = arith.constant 0 : i32
    return %arg0, %c0_i32 : i32, i32
  }
}

</mosaic_0001>

<bundles_post_ra>
// kernel: tpu_custom_call.1
= control target key start
LH: loop header
LB: loop body
LE: loop exit
PB: predicated region body
PF: predicated region fallthrough
CT: control target
= control target key end

     0   :  { %9 = vsyncpa [#allocation4], 0  ;;  %s428_s0 = inlined_call_operand.hbm [shape: f32[2,8,32], index: 0, kind: input, shape index: {}]   ;;  %s429_s1 = inlined_call_operand.vmem [shape: f32[1,32], index: 1, kind: input, shape index: {}]   ;;  %s430_s2 = inlined_call_operand.<no memory space> [shape: f32[1,1], index: 2, kind: input, shape index: {}]   ;;  %s431_s3 = inlined_call_operand.hbm [shape: f32[2,32], index: 3, kind: output, shape index: {}]  }
   0x1   :  { %10 = vsyncpa [#allocation5], 0  ;;  %s366_s12 = smov [#allocation3]   ;;  %s318_s16 = scalar_lea.hbm %s428_s0, 256 }
   0x2   :  { %s16_s13 = sshll.u32 %s366_s12, 4  ;;  %p319_p0 = scmp.ne.s32.totalorder %s428_s0, %s318_s16  ;;  %s17_s13 = int_to_ptr.vmem [resolvable:$true] %s16_s13 }
   0x3   :  { %p322_p1 = scmp.lt.u32.totalorder %s318_s16, %s428_s0 }
   0x5   :  { %p324_p2 = pnand %p322_p1, %p319_p0 }
   0x7   :  { %327 = shalt.err (!%p324_p2)
}
   0x8   :  { %s328_s21 = scalar_lea.vmem %s17_s13, 256  ;;  %p333_p4 = scmp.lt.s32.totalorder %s17_s13, %s17_s13 }
   0x9   :  { %p329_p3 = scmp.ne.s32.totalorder %s17_s13, %s328_s21  ;;  %p334_p5 = scmp.lt.s32.totalorder %s328_s21, %s328_s21 }
   0xb   :  { %p335_p6 = por %p334_p5, %p333_p4 }
   0xd   :  { %p336_p7 = pnand %p335_p6, %p329_p3 }
   0xf   :  { %339 = shalt.err (!%p336_p7)
}
  0x10   :  { %s367_s22 = smov 128   ;;  %s368_s23 = smov 8  }
  0x11   :  { %22 = dma.hbm_to_vmem [thread:$0]  %s428_s0, 256, %s17_s13, [#allocation4], %s367_s22, %s367_s22, %s368_s23  }
  0x12   :  { %362 = dma.done.wait [#allocation4], 256  }
  0x13   :  { %363 = vsyncadd [#allocation4], 4294967040  ;;  %v30_v0 = vld [vmem:[#allocation3] sm:$0xff]  ;;  %vm42_vm0 = vcmask 261120   ;;  %v31_v2 = vld [vmem:[#allocation3 + $0x8] sm:$0xff]  ;;  %v54_v7 = vlaneseq  ;;  %v49_v10 = vstv %s430_s2  ;;  %vm64_vm1 = vcmask 1041409  }
  0x14   :  { %v284_v1 = vld [vmem:[%s429_s1] ss:$0 sm:$0xff]  ;;  %vm67_vm2 = vcmask 58368   ;;  %v369_v20 = vmov 0   ;;  %v370_v32 = vmov 0.0   ;;  %vm371_vm3 = vmmov 0  }
  0x15   :  { %v40_v3 = vmul.f32 %v284_v1, %v30_v0  ;;  %v41_v4 = vmul.f32 %v284_v1, %v31_v2  ;;  %v55_v8 = vand.u32 127, %v54_v7  ;;  %v57_v9 = vshrl.u32 %v54_v7, 7  ;;  %309 = vset.pattern.permute.xlu0 %v369_v20  ;;  %308 = vset.pattern.permute.xlu1 %v369_v20  ;;  %s372_s1 = smov [#allocation6]  }
  0x16   :  { %291 = vmatprep.subr.mxu0 %v370_v32  ;;  %296 = vmatprep.subr.mxu1 %v370_v32  ;;  %vm109_vm4 = vcmask 64512   ;;  %s275_s2 = sshll.u32 %s372_s1, 4  ;;  %vm267_vm5 = vcmask 254976   ;;  %s276_s2 = int_to_ptr.vmem [resolvable:$true] %s275_s2 }
  0x17   :  { %v43_v5 = vsel %vm42_vm0, %v40_v3, 0.0  ;;  %v46_v6 = vsel %vm42_vm0, %v41_v4, 0.0  ;;  %v58_v12 = vsub.s32 %v55_v8, %v57_v9  ;;  %v74_v21 = vsub.s32 0, %v57_v9  ;;  %292 = vmatpush3.msra.mxu0 %v30_v0  ;;  %293 = vmatprep.mubr.msk.f32.mxu0 %vm371_vm3, %v370_v32  ;;  %s340_s29 = scalar_lea.vmem %s276_s2, 32  ;;  %p345_p9 = scmp.lt.s32.totalorder %s276_s2, %s276_s2 }
  0x18   :  { %44 = vadd.xlane.f32.xlu0 %v43_v5  ;;  %v78_v22 = vsub.s32 1, %v57_v9  ;;  %297 = vmatpush3.msra.mxu1 %v31_v2  ;;  %p341_p8 = scmp.ne.s32.totalorder %s276_s2, %s340_s29  ;;  %p346_p10 = scmp.lt.s32.totalorder %s340_s29, %s340_s29 }
  0x19   :  { %298 = vmatprep.mubr.msk.f32.mxu1 %vm371_vm3, %v370_v32 }
  0x1a   :  { %p347_p11 = por %p346_p10, %p345_p9 }
  0x1c   :  { %47 = vadd.xlane.f32.xlu0 %v46_v6  ;;  %p348_p12 = pnand %p347_p11, %p341_p8 }
  0xa5   :  { %v45_v11 = vpop.xlane.xlu0 %44 }
  0xa6   :  { %v50_v13 = vadd.f32 %v49_v10, %v45_v11 }
  0xa8   :  { %v59_v16 = vrot.slane %v50_v13, %v58_v12 }
  0xa9   :  { %v48_v14 = vpop.xlane.xlu0 %47 }
  0xaa   :  { %v51_v15 = vadd.f32 %v49_v10, %v48_v14 }
  0xac   :  { %v63_v17 = vrot.slane %v51_v15, %v58_v12 }
  0xae   :  { %v65_v18 = vsel %vm64_vm1, %v63_v17, %v59_v16 }
  0xaf   :  { %v68_v19 = vsel %vm67_vm2, %v65_v18, -inf }
  0xb0   :  { %69 = vmax.xlane.f32.xlu1 %v68_v19 }
 0x13d   :  { %v70_v23 = vpop.xlane.xlu1 %69 }
 0x13e   :  { %v75_v24 = vrot.slane %v70_v23, %v74_v21  ;;  %v79_v25 = vrot.slane %v70_v23, %v78_v22 }
 0x140   :  { %v82_v26 = vsub.f32 %v50_v13, %v75_v24  ;;  %v83_v27 = vsub.f32 %v51_v15, %v79_v25 }
 0x142   :  { %v84_v28 = vmul.f32 1.442695, %v82_v26  ;;  %v86_v29 = vmul.f32 1.442695, %v83_v27 }
 0x144   :  { %310 = vpow2.f32 %v84_v28 }
 0x145   :  { %312 = vpow2.f32 %v86_v29 }
 0x14e   :  { %v311_v30 = vpop.eup %310 }
 0x14f   :  { %v313_v31 = vpop.eup %312  ;;  %91 = vperm.xlu0 %309, %v311_v30  }
 0x150   :  { %94 = vperm.xlu1 %308, %v313_v31  }
 0x1ce   :  { %v92_v33 = vpop.permute.xlu0 %91 }
 0x1cf   :  { %v95_v34 = vpop.permute.xlu1 %94  ;;  %v99_v35 = vrot.slane %v92_v33, %v58_v12 }
 0x1d0   :  { %v103_v36 = vrot.slane %v95_v34, %v58_v12 }
 0x1d1   :  { %294 = vmatmul.mubr.msk.f32.vlgmr.msra.gmra.mrb[0].mxu0 %vm109_vm4, %v99_v35 }
 0x1d2   :  { %299 = vmatmul.mubr.msk.f32.vlgmr.msra.gmra.mrb[0].mxu1 %vm109_vm4, %v103_v36  ;;  %v104_v37 = vsel %vm64_vm1, %v103_v36, %v99_v35 }
 0x1d3   :  { %v106_v38 = vsel %vm67_vm2, %v104_v37, 0.0 }
 0x1d4   :  { %107 = vadd.xlane.f32.xlu1 %v106_v38 }
 0x261   :  { %v108_v39 = vpop.xlane.xlu1 %107 }
 0x262   :  { %v255_v40 = vrot.slane %v108_v39, 1 }
 0x264   :  { %314 = vrcp.f32 %v255_v40 }
 0x265   :  { %316 = vrcp.f32 %v108_v39 }
 0x26e   :  { %v315_v42 = vpop.eup %314 }
 0x26f   :  { %v317_v47 = vpop.eup %316 }
 0x2a4   :  { %v178_v41 = vpop.f32.mrb[0].mxu0 }
 0x2a5   :  { %v250_v43 = vpop.f32.mrb[0].mxu1  ;;  %v295_v44 = vpop.f32.mrb[1].mxu0  ;;  %v259_v48 = vmul.f32 %v317_v47, %v178_v41 }
 0x2a6   :  { %v261_v45 = vmul.f32 %v315_v42, %v250_v43  ;;  %v300_v46 = vpop.f32.mrb[1].mxu1 }
 0x2a8   :  { %v264_v49 = vrot.slane %v261_v45, 7 }
 0x2aa   :  { %v265_v50 = vsel %vm64_vm1, %v264_v49, %v259_v48 }
 0x2ab   :  { %268 = vst.msk [vmem:[#allocation6] sm:$0x3] %vm267_vm5, %v265_v50 }
 0x2ac   :  { %351 = shalt.err (!%p348_p12)
}
 0x2ad   :  { %s352_s5 = scalar_lea.hbm %s431_s3, 32 }
 0x2ae   :  { %p353_p13 = scmp.ne.s32.totalorder %s431_s3, %s352_s5  ;;  %p356_p0 = scmp.lt.u32.totalorder %s352_s5, %s431_s3 }
 0x2b0   :  { %p358_p1 = pnand %p356_p0, %p353_p13 }
 0x2b2   :  { %361 = shalt.err (!%p358_p1)
}
 0x2b3   :  { %278 = dma.vmem_to_hbm [thread:$0]  %s276_s2, 32, %s431_s3, [#allocation5]  }
 0x2b4   :  { %364 = dma.done.wait [#allocation5], 32  }
 0x2b5   :  { %365 = vsyncadd [#allocation5], 4294967264 }
 0x2b6   :  { %282 = vsyncpa [#allocation4], 1 }
 0x2b7   :  { %283 = vsyncpa [#allocation5], 1 }

</bundles_post_ra>
